<compile_context>
chip_gen: v7x
topology: tpu7x:2x2x1
jax: 0.10.0
libtpu: 0.0.40
codegen_flags: <defaults>
</compile_context>

<pallas_src>
import functools
import math

import jax
import jax.numpy as jnp
from jax.experimental import pallas as pl
from jax.experimental.pallas import tpu as pltpu


# --------------------------- chip-aware sizing ------------------------------ #

@functools.lru_cache(maxsize=None)
def _chip_params():
    """Returns (target_tile_bytes, vmem_limit_bytes_or_None, tensorcores_per_chip)."""
    kind = ""
    try:
        kind = (jax.devices()[0].device_kind or "").lower()
    except Exception:
        pass
    if "v7" in kind:
        # 3.2 TB/s HBM makes per-step overhead relatively expensive -> big tiles.
        # 2x(in+out) buffering of 8 MiB tiles = 32 MiB; raise scoped VMEM (64 MiB phys).
        return (8 << 20, 48 << 20, 2)
    if "v6" in kind:
        # 4 MiB tiles -> 16 MiB buffered < 32 MiB default scoped VMEM (128 MiB phys).
        return (4 << 20, None, 1)
    if "v5" in kind and ("lite" in kind or "v5e" in kind):
        # v5e default scoped VMEM is only 16 MiB; 2 MiB tiles -> 8 MiB buffered.
        return (2 << 20, None, 1)
    # Unknown / other generations (v4, v5p, interpreter): conservative, safe everywhere.
    return (2 << 20, None, 1)


def _sublane_multiple(dtype):
    # Sub-32-bit dtypes pack along sublanes: f32 -> 8 rows/vreg, bf16 -> 16, int8/fp8 -> 32.
    bits = jnp.dtype(dtype).itemsize * 8
    return max(8, 256 // bits)


# ----------------------------- kernel --------------------------------------- #

def _bias_add_kernel(x_ref, b_ref, o_ref):
    # Broadcast add; works for (TN, TC) + (1, TC) and (1, cb, ts) + (1, cb, 1).
    o_ref[...] = x_ref[...] + b_ref[...]


# ----------------------------- 2D path -------------------------------------- #

def _add_bias_2d_call(x, bias_row, out_dtype):
    """x: (N, C); bias_row: (C,). Output dtype = out_dtype (promoted)."""
    N, C = x.shape
    target, vmem_limit, n_cores = _chip_params()
    out_itemsize = jnp.dtype(out_dtype).itemsize
    sub = _sublane_multiple(x.dtype)

    # Column (lane) tiling: only kicks in when a single row is huge.  Sized so
    # that `sub` rows of one column tile always fit the byte target.
    lane_cap = max(128, (target // max(1, sub * out_itemsize)) // 128 * 128)
    tc = C if C <= lane_cap else lane_cap          # multiple of 128 or full extent

    # Row (sublane) tiling from the byte target (no artificial row cap).
    rows_cap = max(sub, (target // max(1, tc * out_itemsize)) // sub * sub)
    if N <= rows_cap:
        tn = N
        if n_cores > 1 and N >= 2 * sub:
            # Keep both TensorCores busy on megacore parts (v7x): >=2 parallel tiles.
            tn = ((N + 1) // 2 + sub - 1) // sub * sub
    else:
        tn = rows_cap

    b2d = bias_row.reshape(1, C)
    grid = (pl.cdiv(N, tn), pl.cdiv(C, tc))

    return pl.pallas_call(
        _bias_add_kernel,
        out_shape=jax.ShapeDtypeStruct((N, C), out_dtype),
        grid_spec=pltpu.PrefetchScalarGridSpec(
            num_scalar_prefetch=0,
            grid=grid,
            in_specs=[
                pl.BlockSpec((tn, tc), lambda i, j: (i, j)),   # x tile
                pl.BlockSpec((1, tc), lambda i, j: (0, j)),    # bias row, resident in VMEM
            ],
            out_specs=pl.BlockSpec((tn, tc), lambda i, j: (i, j)),
        ),
        compiler_params=pltpu.CompilerParams(
            dimension_semantics=("parallel", "parallel"),
            vmem_limit_bytes=vmem_limit),
    )(x, b2d)


def add_bias_2d(x, bias_flat):
    N, C = x.shape
    out_dtype = jnp.promote_types(x.dtype, bias_flat.dtype)

    # Lane-density fold: if C < 128, fold R consecutive rows into one so the
    # kernel's last dim is a multiple of 128 (unmasked vector stores).  N is
    # padded up to a multiple of R (zero rows, sliced off afterwards).
    if C < 128:
        r = math.lcm(C, 128) // C
        if r > 1:
            n_pad = (-N) % r
            xp = jnp.pad(x, ((0, n_pad), (0, 0))) if n_pad else x
            xf = xp.reshape((N + n_pad) // r, r * C)
            bf = jnp.tile(bias_flat, r)
            out = _add_bias_2d_call(xf, bf, out_dtype)
            out = out.reshape(N + n_pad, C)
            return out[:N] if n_pad else out

    return _add_bias_2d_call(x, bias_flat, out_dtype)


# ----------------------------- 4D path -------------------------------------- #

def _choose_4d_tiling(C, HW, itemsize, sub, target):
    """Pick (cb, ts): channel/spatial tile, every branch byte-capped."""
    # Spatial tile: multiple of 128 lanes (partial final block is fine) or full extent.
    lane_cap = max(128, (target // max(1, itemsize)) // 128 * 128)
    ts = HW if HW <= lane_cap else lane_cap
    # Channel tile: multiple of `sub` sublanes or full extent.
    sub_cap = max(sub, (target // max(1, ts * itemsize)) // sub * sub)
    cb = C if C <= sub_cap else sub_cap
    # If the channel floor pushed the tile above target, re-shrink the spatial tile
    # (to a multiple of 128, which stays a legal block dim).
    if cb * ts * itemsize > target and ts > 128:
        ts2 = max(128, (target // max(1, cb * itemsize)) // 128 * 128)
        if ts2 < ts:
            ts = ts2
    return cb, ts


def add_bias_4d(x, bias_flat):
    N, C, H, W = x.shape
    HW = H * W
    out_dtype = jnp.promote_types(x.dtype, bias_flat.dtype)
    target, vmem_limit, _ = _chip_params()
    out_itemsize = jnp.dtype(out_dtype).itemsize

    # Small feature maps: collapse to the 2D path -- one lane-dense row per image
    # (eliminates per-step / per-DMA overhead of tiny (1, cb, ts) blocks).
    if C * HW * out_itemsize <= target:
        x2 = x.reshape(N, C * HW)
        b2 = jnp.repeat(bias_flat, HW)        # channel-major flatten matches NCHW layout
        out = add_bias_2d(x2, b2)
        return out.reshape(N, C, H, W)

    # Large feature maps: (N, C, HW) layout (free reshape for NCHW), lane-dense
    # spatial tiles, bias resident in VMEM as a (1, cb, 1) block.
    x3 = x.reshape(N, C, HW)
    b3 = bias_flat.reshape(1, C, 1)
    sub = _sublane_multiple(x.dtype)
    cb, ts = _choose_4d_tiling(C, HW, out_itemsize, sub, target)
    grid = (N, pl.cdiv(C, cb), pl.cdiv(HW, ts))

    out3 = pl.pallas_call(
        _bias_add_kernel,
        out_shape=jax.ShapeDtypeStruct((N, C, HW), out_dtype),
        grid_spec=pltpu.PrefetchScalarGridSpec(
            num_scalar_prefetch=0,
            grid=grid,
            in_specs=[
                pl.BlockSpec((1, cb, ts), lambda n, c, s: (n, c, s)),  # x tile
                pl.BlockSpec((1, cb, 1), lambda n, c, s: (0, c, 0)),   # bias tile (VMEM)
            ],
            out_specs=pl.BlockSpec((1, cb, ts), lambda n, c, s: (n, c, s)),
        ),
        compiler_params=pltpu.CompilerParams(
            dimension_semantics=("parallel", "parallel", "parallel"),
            vmem_limit_bytes=vmem_limit),
    )(x3, b3)
    return out3.reshape(N, C, H, W)


# ----------------------------- module --------------------------------------- #

class AddBias:
    """JAX/Pallas port of the PyTorch AddBias module."""

    def __init__(self, bias):
        # Matches nn.Parameter(bias.unsqueeze(1)): stored shape (C, 1).
        self._bias = jnp.asarray(bias).reshape(-1, 1)

    def __call__(self, x):
        bias_flat = self._bias.reshape(-1)  # == self._bias.t().view(-1)
        if x.ndim == 2:
            return add_bias_2d(x, bias_flat)
        assert x.ndim == 4, "AddBias expects a 2D or 4D (NCHW) input"
        return add_bias_4d(x, bias_flat)


# ------------------------------ main ----------------------------------------- #

if __name__ == "__main__":
    key = jax.random.PRNGKey(0)
    keys = jax.random.split(key, 8)

    # --- spec shapes: N=2, C=4, H=W=16 ----------------------------------------
    N, C, H, W = 2, 4, 16, 16
    bias = jax.random.normal(keys[0], (C,), dtype=jnp.float32)
    module = AddBias(bias)

    # 4D path (small feature map -> collapsed lane-dense 2D block)
    x4 = jax.random.normal(keys[1], (N, C, H, W), dtype=jnp.float32)
    out4 = jax.block_until_ready(module(x4))
    ref4 = x4 + bias.reshape(1, C, 1, 1)
    assert out4.shape == ref4.shape and out4.dtype == ref4.dtype
    assert jnp.allclose(out4, ref4, atol=1e-6), "4D mismatch"

    # 2D path (N, C) with narrow-C fold
    x2 = jax.random.normal(keys[2], (N, C), dtype=jnp.float32)
    out2 = jax.block_until_ready(module(x2))
    ref2 = x2 + bias.reshape(1, C)
    assert out2.shape == ref2.shape and out2.dtype == ref2.dtype
    assert jnp.allclose(out2, ref2, atol=1e-6), "2D mismatch"

    # --- extra check: row-tiled lane-dense 2D path -----------------------------
    C2 = 256
    bias_b = jax.random.normal(keys[3], (C2,), dtype=jnp.float32)
    x2b = jax.random.normal(keys[4], (1536, C2), dtype=jnp.float32)
    out2b = jax.block_until_ready(AddBias(bias_b)(x2b))
    assert jnp.allclose(out2b, x2b + bias_b.reshape(1, C2), atol=1e-6), "tiled 2D mismatch"

    # --- extra check: narrow-C fold with N not a multiple of the fold factor ---
    C3 = 32
    bias_c = jax.random.normal(keys[5], (C3,), dtype=jnp.float32)
    x2c = jax.random.normal(keys[6], (130, C3), dtype=jnp.float32)  # 130 % 4 != 0 -> pad path
    out2c = jax.block_until_ready(AddBias(bias_c)(x2c))
    assert jnp.allclose(out2c, x2c + bias_c.reshape(1, C3), atol=1e-6), "folded 2D mismatch"

    # --- extra check: bf16 input + f32 bias -> promoted f32 output -------------
    x2d = jax.random.normal(keys[7], (64, C2), dtype=jnp.bfloat16)
    out2d = jax.block_until_ready(AddBias(bias_b)(x2d))
    ref2d = x2d.astype(jnp.float32) + bias_b.reshape(1, C2)
    assert out2d.dtype == jnp.float32
    assert jnp.allclose(out2d, ref2d, atol=1e-3), "bf16 promotion mismatch"

    print("KERNEL_OK")
</pallas_src>

<mosaic_0001>
module attributes {stable_mosaic.version = 11 : i64} {
  func.func @_bias_add_kernel(%arg0: i32, %arg1: i32, %arg2: memref<2x1024xf32, #tpu.memory_space<vmem>>, %arg3: memref<1x1024xf32, #tpu.memory_space<vmem>>, %arg4: memref<2x1024xf32, #tpu.memory_space<vmem>>) attributes {dimension_semantics = [#tpu.dimension_semantics<parallel>, #tpu.dimension_semantics<parallel>], iteration_bounds = array<i64: 1, 1>, scalar_prefetch = 0 : i64, scratch_operands = 0 : i64, tpu.core_type = #tpu.core_type<tc>, window_params = [{transform_indices = @transform_0, window_bounds = array<i64: 2, 1024>}, {transform_indices = @transform_1, window_bounds = array<i64: 1, 1024>}, {transform_indices = @transform_2, window_bounds = array<i64: 2, 1024>}]} {
    %c0 = arith.constant 0 : index
    %c0_0 = arith.constant 0 : index
    %0 = vector.load %arg2[%c0, %c0_0] : memref<2x1024xf32, #tpu.memory_space<vmem>>, vector<2x1024xf32>
    %c0_1 = arith.constant 0 : index
    %c0_2 = arith.constant 0 : index
    %1 = vector.load %arg3[%c0_1, %c0_2] : memref<1x1024xf32, #tpu.memory_space<vmem>>, vector<1x1024xf32>
    %2 = vector.broadcast %1 : vector<1x1024xf32> to vector<2x1024xf32>
    %3 = arith.addf %0, %2 : vector<2x1024xf32>
    %c0_3 = arith.constant 0 : index
    %c0_4 = arith.constant 0 : index
    %4 = vector.load %arg4[%c0_3, %c0_4] : memref<2x1024xf32, #tpu.memory_space<vmem>>, vector<2x1024xf32>
    tpu.vector_store %arg4[%c0_3, %c0_4], %3 {strides = array<i32>} : memref<2x1024xf32, #tpu.memory_space<vmem>>, vector<2x1024xf32>,
    return
  }
  func.func @transform_0(%arg0: i32, %arg1: i32) -> (i32, i32) {
    %c0_i32 = arith.constant 0 : i32
    return %arg0, %arg1 : i32, i32
  }
  func.func @transform_1(%arg0: i32, %arg1: i32) -> (i32, i32) {
    %c0_i32 = arith.constant 0 : i32
    %c0_i32_0 = arith.constant 0 : i32
    return %c0_i32, %arg1 : i32, i32
  }
  func.func @transform_2(%arg0: i32, %arg1: i32) -> (i32, i32) {
    %c0_i32 = arith.constant 0 : i32
    return %arg0, %arg1 : i32, i32
  }
}

</mosaic_0001>

<bundles_post_ra>
// kernel: tpu_custom_call.1
= control target key start
LH: loop header
LB: loop body
LE: loop exit
PB: predicated region body
PF: predicated region fallthrough
CT: control target
= control target key end

     0   :  { %7 = vsyncpa [#allocation3], 0  ;;  %s259_s0 = inlined_call_operand.hbm [shape: f32[2,1024], index: 0, kind: input, shape index: {}]   ;;  %s260_s1 = inlined_call_operand.hbm [shape: f32[1,1024], index: 1, kind: input, shape index: {}]   ;;  %s261_s2 = inlined_call_operand.hbm [shape: f32[2,1024], index: 2, kind: output, shape index: {}]  }
   0x1   :  { %8 = vsyncpa [#allocation6], 0 }
   0x2   :  { %9 = vsyncpa [#allocation4], 0  ;;  %s204_s9 = smov [#allocation2]   ;;  %s205_s11 = smov [#allocation5]  }
   0x3   :  { %s16_s10 = sshll.u32 %s204_s9, 4  ;;  %s26_s12 = sshll.u32 %s205_s11, 4  ;;  %s17_s10 = int_to_ptr.vmem [resolvable:$true] %s16_s10  ;;  %s27_s12 = int_to_ptr.vmem [resolvable:$true] %s26_s12 }
   0x4   :  { %s132_s15 = scalar_lea.hbm %s259_s0, 256 }
   0x5   :  { %p133_p0 = scmp.ne.s32.totalorder %s259_s0, %s132_s15  ;;  %p136_p1 = scmp.lt.u32.totalorder %s132_s15, %s259_s0 }
   0x7   :  { %p138_p2 = pnand %p136_p1, %p133_p0 }
   0x9   :  { %141 = shalt.err (!%p138_p2)
}
   0xa   :  { %s142_s20 = scalar_lea.vmem %s17_s10, 256  ;;  %p147_p4 = scmp.lt.s32.totalorder %s17_s10, %s17_s10 }
   0xb   :  { %p143_p3 = scmp.ne.s32.totalorder %s17_s10, %s142_s20  ;;  %p148_p5 = scmp.lt.s32.totalorder %s142_s20, %s142_s20 }
   0xd   :  { %p149_p6 = por %p148_p5, %p147_p4 }
   0xf   :  { %p150_p7 = pnand %p149_p6, %p143_p3 }
  0x11   :  { %153 = shalt.err (!%p150_p7)
}
  0x12   :  { %19 = dma.hbm_to_vmem [thread:$0]  %s259_s0, 256, %s17_s10, [#allocation3]  }
  0x13   :  { %s154_s25 = scalar_lea.hbm %s260_s1, 128 }
  0x14   :  { %p155_p8 = scmp.ne.s32.totalorder %s260_s1, %s154_s25  ;;  %p158_p9 = scmp.lt.u32.totalorder %s154_s25, %s260_s1 }
  0x16   :  { %p160_p10 = pnand %p158_p9, %p155_p8 }
  0x18   :  { %163 = shalt.err (!%p160_p10)
}
  0x19   :  { %s164_s30 = scalar_lea.vmem %s27_s12, 128  ;;  %p169_p12 = scmp.lt.s32.totalorder %s27_s12, %s27_s12 }
  0x1a   :  { %p165_p11 = scmp.ne.s32.totalorder %s27_s12, %s164_s30  ;;  %p170_p13 = scmp.lt.s32.totalorder %s164_s30, %s164_s30 }
  0x1c   :  { %p171_p0 = por %p170_p13, %p169_p12 }
  0x1e   :  { %p172_p1 = pnand %p171_p0, %p165_p11 }
  0x20   :  { %175 = shalt.err (!%p172_p1)
}
  0x21   :  { %29 = dma.hbm_to_vmem [thread:$0]  %s260_s1, 128, %s27_s12, [#allocation6]  }
  0x22   :  { %198 = dma.done.wait [#allocation3], 256  }
  0x23   :  { %199 = vsyncadd [#allocation3], 4294967040 }
  0x24   :  { %200 = dma.done.wait [#allocation6], 128  }
  0x25   :  { %201 = vsyncadd [#allocation6], 4294967168  ;;  %v40_v0 = vlaneseq  ;;  %v206_v1 = vmov 1983009808   ;;  %v38_v13 = vld [vmem:[#allocation5] sm:$0xff]  ;;  %v36_v29 = vld [vmem:[#allocation2] sm:$0xff] }
  0x26   :  { %v75_v2 = vunpack.c.l.s4 %v206_v1  ;;  %v37_v33 = vld [vmem:[#allocation2 + $0x8] sm:$0xff]  ;;  %s207_s1 = smov [#allocation7]  }
  0x27   :  { %v41_v3 = vshrl.u32 %v40_v0, 7  ;;  %s118_s4 = sshll.u32 %s207_s1, 4  ;;  %s119_s4 = int_to_ptr.vmem [resolvable:$true] %s118_s4 }
  0x28   :  { %v76_v4 = vunpack.c.0.s8 %v75_v2  ;;  %s176_s5 = scalar_lea.vmem %s119_s4, 256  ;;  %p181_p3 = scmp.lt.s32.totalorder %s119_s4, %s119_s4 }
  0x29   :  { %v42_v5 = vsub.s32 0, %v41_v3  ;;  %v46_v6 = vsub.s32 1, %v41_v3  ;;  %v50_v7 = vsub.s32 2, %v41_v3  ;;  %v54_v8 = vsub.s32 3, %v41_v3  ;;  %p177_p2 = scmp.ne.s32.totalorder %s119_s4, %s176_s5  ;;  %p182_p4 = scmp.lt.s32.totalorder %s176_s5, %s176_s5 }
  0x2a   :  { %v58_v9 = vsub.s32 4, %v41_v3  ;;  %v62_v10 = vsub.s32 5, %v41_v3  ;;  %v66_v11 = vsub.s32 6, %v41_v3  ;;  %v70_v12 = vsub.s32 7, %v41_v3 }
  0x2b   :  { %v79_v14 = vsub.s32 %v76_v4, %v41_v3  ;;  %v43_v15 = vrot.slane %v38_v13, %v42_v5  ;;  %v47_v16 = vrot.slane %v38_v13, %v46_v6  ;;  %v51_v17 = vrot.slane %v38_v13, %v50_v7  ;;  %p183_p5 = por %p182_p4, %p181_p3 }
  0x2c   :  { %v55_v18 = vrot.slane %v38_v13, %v54_v8  ;;  %v59_v19 = vrot.slane %v38_v13, %v58_v9  ;;  %v63_v20 = vrot.slane %v38_v13, %v62_v10  ;;  %v67_v21 = vrot.slane %v38_v13, %v66_v11 }
  0x2d   :  { %v71_v22 = vrot.slane %v38_v13, %v70_v12  ;;  %v72_v23 = vcombine.low %v43_v15, %v47_v16  ;;  %p184_p6 = pnand %p183_p5, %p177_p2 }
  0x2e   :  { %v73_v24 = vcombine.low %v51_v17, %v55_v18  ;;  %v89_v25 = vcombine.low %v59_v19, %v63_v20 }
  0x2f   :  { %v90_v26 = vcombine.low %v67_v21, %v71_v22  ;;  %v80_v27 = vrot.slane %v72_v23, %v79_v14 }
  0x30   :  { %v87_v28 = vrot.slane %v73_v24, %v79_v14  ;;  %v97_v30 = vrot.slane %v89_v25, %v79_v14 }
  0x31   :  { %v104_v31 = vrot.slane %v90_v26, %v79_v14 }
  0x32   :  { %v88_v32 = vcombine.low %v80_v27, %v87_v28 }
  0x33   :  { %v105_v34 = vcombine.low %v97_v30, %v104_v31 }
  0x34   :  { %v108_v35 = vadd.f32 %v88_v32, %v36_v29 }
  0x35   :  { %v109_v36 = vadd.f32 %v105_v34, %v37_v33 }
  0x36   :  { %110 = vst [vmem:[#allocation7] sm:$0xff] %v108_v35 }
  0x37   :  { %111 = vst [vmem:[#allocation7 + $0x8] sm:$0xff] %v109_v36 }
  0x38   :  { %187 = shalt.err (!%p184_p6)
}
  0x39   :  { %s188_s8 = scalar_lea.hbm %s261_s2, 256 }
  0x3a   :  { %p189_p7 = scmp.ne.s32.totalorder %s261_s2, %s188_s8  ;;  %p192_p8 = scmp.lt.u32.totalorder %s188_s8, %s261_s2 }
  0x3c   :  { %p194_p9 = pnand %p192_p8, %p189_p7 }
  0x3e   :  { %197 = shalt.err (!%p194_p9)
}
  0x3f   :  { %121 = dma.vmem_to_hbm [thread:$0]  %s119_s4, 256, %s261_s2, [#allocation4]  }
  0x40   :  { %202 = dma.done.wait [#allocation4], 256  }
  0x41   :  { %203 = vsyncadd [#allocation4], 4294967040 }
  0x42   :  { %125 = vsyncpa [#allocation3], 1 }
  0x43   :  { %126 = vsyncpa [#allocation6], 1 }
  0x44   :  { %127 = vsyncpa [#allocation4], 1 }

</bundles_post_ra>
